<compile_context>
chip_gen: v6e
topology: v6e:2x2x1
jax: 0.10.0
libtpu: 0.0.40
codegen_flags: <defaults>
</compile_context>

<pallas_src>
import numpy as np
import jax
import jax.numpy as jnp
from jax.experimental import pallas as pl
from jax.experimental.pallas import tpu as pltpu

# ----------------------------------------------------------------------------
# Small, deterministic stand-ins for the module's hyper-parameters
# ----------------------------------------------------------------------------
IN_CHANNELS = 1
NB_BLOCK = 1
K = 3
NB_CHEV_FILTER = 8
NB_TIME_FILTER = 8
TIME_STRIDES = 1
NUM_FOR_PREDICT = 4
LEN_INPUT = 8
NODES = 16
NUM_CLIENTS = 4

WIDE = 512           # lane-dense last dim (multiple of 128 -> unmasked vst)
MIN_TILE_R = 8       # sublane granularity
MAX_TILE_R = 512     # cap: C * 512 * 512 * 4B = 4 MiB input block (C=4)


def astgcn_param_shapes():
    """Parameter tensor shapes of the ASTGCN-style net built by make_model()."""
    shapes = []
    in_c, t = IN_CHANNELS, LEN_INPUT
    for _ in range(NB_BLOCK):
        # temporal attention: U1, U2, U3, b_e, V_e
        shapes += [(NODES,), (in_c, NODES), (in_c,), (1, t, t), (t, t)]
        # spatial attention: W1, W2, W3, b_s, V_s
        shapes += [(t,), (in_c, t), (in_c,), (1, NODES, NODES), (NODES, NODES)]
        # Chebyshev graph conv Theta (K stacked)
        shapes += [(K, in_c, NB_CHEV_FILTER)]
        # temporal conv (1x3) weight + bias
        shapes += [(NB_TIME_FILTER, NB_CHEV_FILTER, 1, 3), (NB_TIME_FILTER,)]
        # residual conv (1x1) weight + bias
        shapes += [(NB_TIME_FILTER, in_c, 1, 1), (NB_TIME_FILTER,)]
        # LayerNorm weight + bias
        shapes += [(NB_TIME_FILTER,), (NB_TIME_FILTER,)]
        in_c, t = NB_TIME_FILTER, t // TIME_STRIDES
    # final conv: (num_for_predict, len_input//time_strides, 1, nb_time_filter) + bias
    shapes += [(NUM_FOR_PREDICT, LEN_INPUT // TIME_STRIDES, 1, NB_TIME_FILTER),
               (NUM_FOR_PREDICT,)]
    return shapes


def model_1d(params):
    """JAX equivalent of FedAsync_Graph.model_1d: flatten each param and concat."""
    return jnp.concatenate([jnp.ravel(p) for p in params], axis=0)


# ----------------------------------------------------------------------------
# Pallas kernel: FedAsync aggregation as one weighted sum over clients
# ----------------------------------------------------------------------------
def fedasync_agg_kernel(coef_ref, client_ref, out_ref):
    # client_ref: (C, TILE_R, WIDE) f32 in VMEM; coef_ref: (C,) f32 in SMEM.
    C = client_ref.shape[0]
    acc = client_ref[0] * coef_ref[0]
    for c in range(1, C):                      # small static C -> unrolled
        acc += client_ref[c] * coef_ref[c]
    out_ref[...] = acc


def pack_clients(client_flat_list, tile_r_cap=MAX_TILE_R):
    """Pad each client's 1-D param vector and stack into a (C, R, WIDE) slab.

    Padding happens per-client before stacking (no second full-slab copy).
    Returns (slab, tile_r, original_length).
    """
    P = int(client_flat_list[0].shape[0])
    base = MIN_TILE_R * WIDE
    padded = ((P + base - 1) // base) * base
    R = padded // WIDE
    if R <= tile_r_cap:
        tile_r = R                             # whole slab in one grid step
    else:
        tile_r = tile_r_cap
        chunk = tile_r * WIDE
        padded = ((P + chunk - 1) // chunk) * chunk
        R = padded // WIDE
    pad = padded - P
    if pad:
        z = jnp.zeros((pad,), client_flat_list[0].dtype)
        client_flat_list = [jnp.concatenate([v, z], axis=0) for v in client_flat_list]
    slab = jnp.stack(client_flat_list, axis=0).reshape(len(client_flat_list), R, WIDE)
    return slab, tile_r, P


def fedasync_aggregate(client_params, weights, tile_r):
    """client_params: (C, R, WIDE) f32, weights: (C,) f32 -> aggregated (R, WIDE)."""
    C, R, L = client_params.shape
    assert L == WIDE and R % tile_r == 0
    n_tiles = R // tile_r

    # Closed-form blend coefficients of the sequential FedAsync loop:
    #   coef[c] = w[c] * prod_{k>c} (1 - w[k])
    one_minus = (1.0 - weights).astype(jnp.float32)
    suffix_all = jnp.cumprod(one_minus[::-1])[::-1]            # prod_{k>=c}
    suffix_gt = jnp.concatenate([suffix_all[1:], jnp.ones((1,), jnp.float32)])
    coef = weights.astype(jnp.float32) * suffix_gt

    grid_spec = pltpu.PrefetchScalarGridSpec(
        num_scalar_prefetch=1,                 # coef lands in SMEM
        grid=(n_tiles,),
        in_specs=[
            pl.BlockSpec((C, tile_r, WIDE), lambda i, coef: (0, i, 0)),
        ],
        out_specs=pl.BlockSpec((tile_r, WIDE), lambda i, coef: (i, 0)),
    )

    return pl.pallas_call(
        fedasync_agg_kernel,
        out_shape=jax.ShapeDtypeStruct((R, WIDE), jnp.float32),
        grid_spec=grid_spec,
        compiler_params=pltpu.CompilerParams(
            dimension_semantics=("parallel",),
            vmem_limit_bytes=32 * 1024 * 1024),
    )(coef, client_params)


# ----------------------------------------------------------------------------
# Driver
# ----------------------------------------------------------------------------
if __name__ == "__main__":
    key = jax.random.PRNGKey(0)
    shapes = astgcn_param_shapes()

    # Deterministic synthetic per-client parameter sets (no checkpoint loading).
    client_flat = []
    for c in range(NUM_CLIENTS):
        params = []
        for s in shapes:
            key, sub = jax.random.split(key)
            params.append(jax.random.normal(sub, s, dtype=jnp.float32))
        client_flat.append(model_1d(params))

    client_params, tile_r, P = pack_clients(client_flat)      # (C, R, WIDE)
    C = client_params.shape[0]

    # Fed_Train uses weight = 0.5 for every selected client.
    weights = jnp.full((C,), 0.5, dtype=jnp.float32)

    out = fedasync_aggregate(client_params, weights, tile_r)
    out = jax.block_until_ready(out)
    agg_flat = np.asarray(out).reshape(-1)[:P]

    # Pure-numpy reference of the sequential aggregation loop in Fed_Train.
    ref = np.zeros(P, dtype=np.float32)
    cf = np.stack([np.asarray(v)[:P] for v in client_flat], axis=0)
    wf = np.asarray(weights)
    for c in range(C):
        ref = ref * (1.0 - wf[c]) + cf[c] * wf[c]

    np.testing.assert_allclose(agg_flat, ref, rtol=1e-5, atol=1e-5)
    print("KERNEL_OK")
</pallas_src>

<mosaic_0001>
module attributes {stable_mosaic.version = 11 : i64} {
  func.func @fedasync_agg_kernel(%arg0: i32, %arg1: memref<4xf32, #tpu.memory_space<smem>>, %arg2: memref<4x8x512xf32, #tpu.memory_space<vmem>>, %arg3: memref<8x512xf32, #tpu.memory_space<vmem>>) attributes {dimension_semantics = [#tpu.dimension_semantics<parallel>], iteration_bounds = array<i64: 1>, scalar_prefetch = 1 : i64, scratch_operands = 0 : i64, tpu.core_type = #tpu.core_type<tc>, window_params = [{transform_indices = @transform_0, window_bounds = array<i64: 4, 8, 512>}, {transform_indices = @transform_1, window_bounds = array<i64: 8, 512>}]} {
    %c0 = arith.constant 0 : index
    %c0_0 = arith.constant 0 : index
    %c0_1 = arith.constant 0 : index
    %0 = vector.load %arg2[%c0, %c0_0, %c0_1] : memref<4x8x512xf32, #tpu.memory_space<vmem>>, vector<1x8x512xf32>
    %1 = vector.shape_cast %0 : vector<1x8x512xf32> to vector<8x512xf32>
    %c0_2 = arith.constant 0 : index
    %2 = memref.load %arg1[%c0_2] : memref<4xf32, #tpu.memory_space<smem>>
    %3 = vector.broadcast %2 : f32 to vector<8x512xf32>
    %4 = arith.mulf %1, %3 : vector<8x512xf32>
    %c1 = arith.constant 1 : index
    %c0_3 = arith.constant 0 : index
    %c0_4 = arith.constant 0 : index
    %5 = vector.load %arg2[%c1, %c0_3, %c0_4] : memref<4x8x512xf32, #tpu.memory_space<vmem>>, vector<1x8x512xf32>
    %6 = vector.shape_cast %5 : vector<1x8x512xf32> to vector<8x512xf32>
    %c1_5 = arith.constant 1 : index
    %7 = memref.load %arg1[%c1_5] : memref<4xf32, #tpu.memory_space<smem>>
    %8 = vector.broadcast %7 : f32 to vector<8x512xf32>
    %9 = arith.mulf %6, %8 : vector<8x512xf32>
    %10 = arith.addf %4, %9 : vector<8x512xf32>
    %c2 = arith.constant 2 : index
    %c0_6 = arith.constant 0 : index
    %c0_7 = arith.constant 0 : index
    %11 = vector.load %arg2[%c2, %c0_6, %c0_7] : memref<4x8x512xf32, #tpu.memory_space<vmem>>, vector<1x8x512xf32>
    %12 = vector.shape_cast %11 : vector<1x8x512xf32> to vector<8x512xf32>
    %c2_8 = arith.constant 2 : index
    %13 = memref.load %arg1[%c2_8] : memref<4xf32, #tpu.memory_space<smem>>
    %14 = vector.broadcast %13 : f32 to vector<8x512xf32>
    %15 = arith.mulf %12, %14 : vector<8x512xf32>
    %16 = arith.addf %10, %15 : vector<8x512xf32>
    %c3 = arith.constant 3 : index
    %c0_9 = arith.constant 0 : index
    %c0_10 = arith.constant 0 : index
    %17 = vector.load %arg2[%c3, %c0_9, %c0_10] : memref<4x8x512xf32, #tpu.memory_space<vmem>>, vector<1x8x512xf32>
    %18 = vector.shape_cast %17 : vector<1x8x512xf32> to vector<8x512xf32>
    %c3_11 = arith.constant 3 : index
    %19 = memref.load %arg1[%c3_11] : memref<4xf32, #tpu.memory_space<smem>>
    %20 = vector.broadcast %19 : f32 to vector<8x512xf32>
    %21 = arith.mulf %18, %20 : vector<8x512xf32>
    %22 = arith.addf %16, %21 : vector<8x512xf32>
    %c0_12 = arith.constant 0 : index
    %c0_13 = arith.constant 0 : index
    %23 = vector.load %arg3[%c0_12, %c0_13] : memref<8x512xf32, #tpu.memory_space<vmem>>, vector<8x512xf32>
    tpu.vector_store %arg3[%c0_12, %c0_13], %22 {strides = array<i32>} : memref<8x512xf32, #tpu.memory_space<vmem>>, vector<8x512xf32>,
    return
  }
  func.func @transform_0(%arg0: i32, %arg1: memref<4xf32, #tpu.memory_space<smem>>) -> (i32, i32, i32) {
    %c0_i32 = arith.constant 0 : i32
    %c0_i32_0 = arith.constant 0 : i32
    %c0_i32_1 = arith.constant 0 : i32
    return %c0_i32, %arg0, %c0_i32_0 : i32, i32, i32
  }
  func.func @transform_1(%arg0: i32, %arg1: memref<4xf32, #tpu.memory_space<smem>>) -> (i32, i32) {
    %c0_i32 = arith.constant 0 : i32
    %c0_i32_0 = arith.constant 0 : i32
    return %arg0, %c0_i32 : i32, i32
  }
}

</mosaic_0001>

<bundles_post_ra>
// kernel: tpu_custom_call.1
= control target key start
LH: loop header
LB: loop body
LE: loop exit
PB: predicated region body
PF: predicated region fallthrough
CT: control target
= control target key end

     0   :  { %s164_s9 = smov [#allocation3]   ;;  %s193_s0 = inlined_call_operand.hbm [shape: f32[4], index: 0, kind: input, shape index: {}]   ;;  %s194_s1 = inlined_call_operand.hbm [shape: f32[4,8,512], index: 1, kind: input, shape index: {}]   ;;  %s195_s2 = inlined_call_operand.hbm [shape: f32[8,512], index: 2, kind: output, shape index: {}]  }
   0x1   :  { %8 = dma.hbm_to_smem %s193_s0, 16, %s164_s9, [#allocation2] }
   0x2   :  { %158 = dma.done.wait [#allocation2], 16 }
   0x3   :  { %159 = vsyncadd [#allocation2], 4294967280 }
   0x4   :  { %10 = sfence }
   0x5   :  { %11 = vsyncpa [#allocation5], 0 }
   0x6   :  { %12 = vsyncpa [#allocation6], 0  ;;  %s165_s12 = smov [#allocation4]  }
   0x7   :  { %s18_s13 = sshll.u32 %s165_s12, 4  ;;  %s19_s13 = int_to_ptr.vmem [resolvable:$true] %s18_s13 }
   0x8   :  { %s126_s14 = scalar_lea.vmem %s19_s13, 2048  ;;  %p131_p1 = scmp.lt.s32.totalorder %s19_s13, %s19_s13 }
   0x9   :  { %p127_p0 = scmp.ne.s32.totalorder %s19_s13, %s126_s14  ;;  %p132_p2 = scmp.lt.s32.totalorder %s126_s14, %s126_s14 }
   0xb   :  { %p133_p3 = por %p132_p2, %p131_p1 }
   0xd   :  { %p134_p4 = pnand %p133_p3, %p127_p0 }
   0xf   :  { %137 = shalt.err (!%p134_p4)
}
  0x10   :  { %s166_s15 = smov 512   ;;  %s167_s16 = smov 32  }
  0x11   :  { %24 = dma.hbm_to_vmem [thread:$0]  %s194_s1, 2048, %s19_s13, [#allocation5], %s166_s15, %s166_s15, %s167_s16  }
  0x12   :  { %160 = dma.done.wait [#allocation5], 2048  }
  0x13   :  { %161 = vsyncadd [#allocation5], 4294965248  ;;  %s32_s0 = sld [smem:[#allocation3]]  ;;  %v28_v0 = vld [vmem:[#allocation4] sm:$0xff]  ;;  %v29_v7 = vld [vmem:[#allocation4 + $0x8] sm:$0xff]  ;;  %s168_s1 = smov [#allocation7]  }
  0x14   :  { %s102_s19 = sld [smem:[#allocation3 + $0x1]]  ;;  %v39_v2 = vld [vmem:[#allocation4 + $0x20] sm:$0xff]  ;;  %v40_v8 = vld [vmem:[#allocation4 + $0x28] sm:$0xff]  ;;  %v30_v15 = vld [vmem:[#allocation4 + $0x10] sm:$0xff]  ;;  %s93_s22 = sshll.u32 %s168_s1, 4  ;;  %s94_s22 = int_to_ptr.vmem [resolvable:$true] %s93_s22 }
  0x15   :  { %s103_s20 = sld [smem:[#allocation3 + $0x2]]  ;;  %v54_v3 = vld [vmem:[#allocation4 + $0x40] sm:$0xff]  ;;  %v55_v13 = vld [vmem:[#allocation4 + $0x48] sm:$0xff]  ;;  %v41_v20 = vld [vmem:[#allocation4 + $0x30] sm:$0xff]  ;;  %s138_s23 = scalar_lea.vmem %s94_s22, 512 }
  0x16   :  { %s104_s21 = sld [smem:[#allocation3 + $0x3]]  ;;  %v69_v6 = vld [vmem:[#allocation4 + $0x60] sm:$0xff]  ;;  %v70_v14 = vld [vmem:[#allocation4 + $0x68] sm:$0xff]  ;;  %v56_v21 = vld [vmem:[#allocation4 + $0x50] sm:$0xff]  ;;  %p139_p5 = scmp.ne.s32.totalorder %s94_s22, %s138_s23 }
  0x17   :  { %v71_v22 = vld [vmem:[#allocation4 + $0x70] sm:$0xff]  ;;  %v31_v27 = vld [vmem:[#allocation4 + $0x18] sm:$0xff]  ;;  %p143_p6 = scmp.lt.s32.totalorder %s94_s22, %s94_s22  ;;  %p144_p7 = scmp.lt.s32.totalorder %s138_s23, %s138_s23 }
  0x18   :  { %v42_v28 = vld [vmem:[#allocation4 + $0x38] sm:$0xff] }
  0x19   :  { %v33_v1 = vstv %s32_s0  ;;  %v57_v29 = vld [vmem:[#allocation4 + $0x58] sm:$0xff]  ;;  %p145_p8 = por %p144_p7, %p143_p6 }
  0x1a   :  { %v34_v4 = vmul.f32 %v33_v1, %v28_v0  ;;  %v44_v5 = vstv %s102_s19  ;;  %v35_v11 = vmul.f32 %v33_v1, %v29_v7  ;;  %v36_v19 = vmul.f32 %v33_v1, %v30_v15  ;;  %v72_v33 = vld [vmem:[#allocation4 + $0x78] sm:$0xff] }
  0x1b   :  { %v45_v9 = vmul.f32 %v44_v5, %v39_v2  ;;  %v59_v10 = vstv %s103_s20  ;;  %v46_v12 = vmul.f32 %v44_v5, %v40_v8  ;;  %v47_v30 = vmul.f32 %v44_v5, %v41_v20  ;;  %p146_p9 = pnand %p145_p8, %p139_p5 }
  0x1c   :  { %v60_v16 = vmul.f32 %v59_v10, %v54_v3  ;;  %v74_v17 = vstv %s104_s21  ;;  %v61_v18 = vmul.f32 %v59_v10, %v55_v13  ;;  %v62_v31 = vmul.f32 %v59_v10, %v56_v21 }
  0x1d   :  { %v49_v23 = vadd.f32 %v45_v9, %v34_v4  ;;  %v75_v24 = vmul.f32 %v74_v17, %v69_v6  ;;  %v50_v25 = vadd.f32 %v46_v12, %v35_v11  ;;  %v76_v26 = vmul.f32 %v74_v17, %v70_v14 }
  0x1e   :  { %v37_v32 = vmul.f32 %v33_v1, %v31_v27  ;;  %v48_v36 = vmul.f32 %v44_v5, %v42_v28  ;;  %v63_v37 = vmul.f32 %v59_v10, %v57_v29  ;;  %v51_v38 = vadd.f32 %v47_v30, %v36_v19 }
  0x1f   :  { %v64_v34 = vadd.f32 %v60_v16, %v49_v23  ;;  %v65_v35 = vadd.f32 %v61_v18, %v50_v25  ;;  %v77_v39 = vmul.f32 %v74_v17, %v71_v22  ;;  %v78_v43 = vmul.f32 %v74_v17, %v72_v33 }
  0x20   :  { %v52_v42 = vadd.f32 %v48_v36, %v37_v32  ;;  %v66_v44 = vadd.f32 %v62_v31, %v51_v38 }
  0x21   :  { %v79_v40 = vadd.f32 %v75_v24, %v64_v34  ;;  %v80_v41 = vadd.f32 %v76_v26, %v65_v35 }
  0x22   :  { %v67_v45 = vadd.f32 %v63_v37, %v52_v42  ;;  %v81_v46 = vadd.f32 %v77_v39, %v66_v44 }
  0x23   :  { %83 = vst [vmem:[#allocation7] sm:$0xff] %v79_v40  ;;  %84 = vst [vmem:[#allocation7 + $0x8] sm:$0xff] %v80_v41 }
  0x24   :  { %v82_v47 = vadd.f32 %v78_v43, %v67_v45  ;;  %85 = vst [vmem:[#allocation7 + $0x10] sm:$0xff] %v81_v46 }
  0x26   :  { %86 = vst [vmem:[#allocation7 + $0x18] sm:$0xff] %v82_v47 }
  0x27   :  { %149 = shalt.err (!%p146_p9)
}
  0x28   :  { %96 = dma.vmem_to_hbm [thread:$0]  %s94_s22, 512, %s195_s2, [#allocation6]  }
  0x29   :  { %162 = dma.done.wait [#allocation6], 512  }
  0x2a   :  { %163 = vsyncadd [#allocation6], 4294966784 }
  0x2b   :  { %100 = vsyncpa [#allocation5], 1 }
  0x2c   :  { %101 = vsyncpa [#allocation6], 1 }

</bundles_post_ra>
